<compile_context>
chip_gen: v5e
topology: v5e:2x2
jax: 0.10.0
libtpu: 0.0.40
codegen_flags: <defaults>
</compile_context>

<pallas_src>
import jax
import jax.numpy as jnp
from jax.experimental import pallas as pl
from jax.experimental.pallas import tpu as pltpu


def _temp_scale_kernel(t_ref, x_ref, o_ref):
    # t_ref: (1,) temperature in SMEM; x_ref/o_ref: (TB, C) tiles in VMEM.
    # clamp(min=1e-6) then take the scalar reciprocal once; multiply on the VPU.
    t = jnp.maximum(t_ref[0], jnp.float32(1e-6))
    inv_t = jnp.float32(1.0) / t  # scalar path; cheaper than a per-element vector divide
    o_ref[...] = (x_ref[...].astype(jnp.float32) * inv_t).astype(o_ref.dtype)


def _round_up(x: int, m: int) -> int:
    return ((x + m - 1) // m) * m


def _sublane_multiple(dtype) -> int:
    itemsize = jnp.dtype(dtype).itemsize
    if itemsize >= 4:
        return 8
    if itemsize == 2:
        return 16
    return 32


def temperature_scale(logits: jax.Array, temperature: jax.Array) -> jax.Array:
    """Apply logits / clamp(temperature, 1e-6) elementwise on TPU via Pallas."""
    assert logits.ndim == 2, "expected (batch, num_classes) logits"
    B, C = logits.shape
    dt = jnp.dtype(logits.dtype)
    sub = _sublane_multiple(dt)

    # Lane-dense last dim: pad classes up to a multiple of 128 (unmasked vst).
    C_pad = _round_up(C, 128)

    # Row tile: keep each tile buffer around <=2 MiB so
    # (in + out) x 2 pipeline buffers stays well under every generation's
    # scoped-VMEM default (16 MiB v5e, 32 MiB v6e/v7x) without flag bumps.
    budget_bytes = 2 * 1024 * 1024
    rows_by_budget = max(sub, (budget_bytes // (C_pad * dt.itemsize)) // sub * sub)
    tb = min(1024, rows_by_budget)
    tb = min(tb, _round_up(B, sub))
    tb = max(tb, sub)

    # Pad rows so the grid has no partial blocks.
    B_pad = _round_up(B, tb)

    if (B_pad, C_pad) != (B, C):
        logits_p = jnp.pad(logits, ((0, B_pad - B), (0, C_pad - C)))
    else:
        logits_p = logits

    t = temperature.reshape((1,)).astype(jnp.float32)

    out = pl.pallas_call(
        _temp_scale_kernel,
        out_shape=jax.ShapeDtypeStruct((B_pad, C_pad), logits.dtype),
        grid=(pl.cdiv(B_pad, tb),),
        in_specs=[
            pl.BlockSpec(memory_space=pltpu.MemorySpace.SMEM),     # temperature scalar
            pl.BlockSpec((tb, C_pad), lambda i: (i, 0)),           # logits row-tile
        ],
        out_specs=pl.BlockSpec((tb, C_pad), lambda i: (i, 0)),
        compiler_params=pltpu.CompilerParams(
            dimension_semantics=("parallel",),                     # megacore on v7x
        ),
    )(t, logits_p)

    if (B_pad, C_pad) != (B, C):
        out = out[:B, :C]
    return out


if __name__ == "__main__":
    key = jax.random.PRNGKey(0)

    # Small shapes consistent with classifier logits: batch=8, classes=128.
    B, C = 8, 128
    logits = jax.random.normal(key, (B, C), dtype=jnp.float32)

    # Parameter init mirroring nn.Parameter(torch.ones(1) * 1.0).
    temperature = jnp.ones((1,), dtype=jnp.float32)

    out = temperature_scale(logits, temperature)
    jax.block_until_ready(out)
    ref = logits / jnp.maximum(temperature, 1e-6)
    assert out.shape == logits.shape and out.dtype == logits.dtype
    assert jnp.allclose(out, ref, atol=1e-5, rtol=1e-5)

    # Second check: non-trivial temperature and non-aligned shapes (exercises
    # the padding path: 5 rows, 10 classes -> padded to (8, 128) internally).
    key2 = jax.random.PRNGKey(0)
    logits2 = jax.random.normal(key2, (5, 10), dtype=jnp.float32)
    temperature2 = jnp.array([1.7], dtype=jnp.float32)
    out2 = temperature_scale(logits2, temperature2)
    jax.block_until_ready(out2)
    ref2 = logits2 / jnp.maximum(temperature2, 1e-6)
    assert out2.shape == logits2.shape and out2.dtype == logits2.dtype
    assert jnp.allclose(out2, ref2, atol=1e-5, rtol=1e-5)

    # TODO(synk): the LBFGS-based `fit()` calibration routine is an optimization
    # loop, not a forward pass, and is intentionally not translated to Pallas.
    print("KERNEL_OK")
</pallas_src>

<mosaic_0001>
module attributes {stable_mosaic.version = 11 : i64} {
  func.func @_temp_scale_kernel(%arg0: i32, %arg1: memref<1xf32, #tpu.memory_space<smem>>, %arg2: memref<8x128xf32, #tpu.memory_space<vmem>>, %arg3: memref<8x128xf32, #tpu.memory_space<vmem>>) attributes {dimension_semantics = [#tpu.dimension_semantics<parallel>], iteration_bounds = array<i64: 1>, scalar_prefetch = 0 : i64, scratch_operands = 0 : i64, tpu.core_type = #tpu.core_type<tc>, window_params = [{transform_indices = @transform_0, window_bounds = array<i64: 1>}, {transform_indices = @transform_1, window_bounds = array<i64: 8, 128>}, {transform_indices = @transform_2, window_bounds = array<i64: 8, 128>}]} {
    %c0 = arith.constant 0 : index
    %0 = memref.load %arg1[%c0] : memref<1xf32, #tpu.memory_space<smem>>
    %cst = arith.constant 9.99999997E-7 : f32
    %1 = arith.maximumf %0, %cst : f32
    %cst_0 = arith.constant 1.000000e+00 : f32
    %2 = arith.divf %cst_0, %1 : f32
    %c0_1 = arith.constant 0 : index
    %c0_2 = arith.constant 0 : index
    %3 = vector.load %arg2[%c0_1, %c0_2] : memref<8x128xf32, #tpu.memory_space<vmem>>, vector<8x128xf32>
    %4 = vector.broadcast %2 : f32 to vector<8x128xf32>
    %5 = arith.mulf %3, %4 : vector<8x128xf32>
    %c0_3 = arith.constant 0 : index
    %c0_4 = arith.constant 0 : index
    %6 = vector.load %arg3[%c0_3, %c0_4] : memref<8x128xf32, #tpu.memory_space<vmem>>, vector<8x128xf32>
    tpu.vector_store %arg3[%c0_3, %c0_4], %5 {strides = array<i32>} : memref<8x128xf32, #tpu.memory_space<vmem>>, vector<8x128xf32>,
    return
  }
  func.func @transform_0(%arg0: i32) -> i32 {
    %c0_i32 = arith.constant 0 : i32
    %c0_i32_0 = arith.constant 0 : i32
    return %c0_i32 : i32
  }
  func.func @transform_1(%arg0: i32) -> (i32, i32) {
    %c0_i32 = arith.constant 0 : i32
    %c0_i32_0 = arith.constant 0 : i32
    return %arg0, %c0_i32 : i32, i32
  }
  func.func @transform_2(%arg0: i32) -> (i32, i32) {
    %c0_i32 = arith.constant 0 : i32
    %c0_i32_0 = arith.constant 0 : i32
    return %arg0, %c0_i32 : i32, i32
  }
}

</mosaic_0001>

<bundles_post_ra>
// kernel: tpu_custom_call.1
= control target key start
LH: loop header
LB: loop body
LE: loop exit
PB: predicated region body
PF: predicated region fallthrough
CT: control target
= control target key end

     0   :  { %8 = vsyncpa [#allocation4], 0  ;;  %s152_s0 = inlined_call_operand.<no memory space> [shape: f32[1], index: 0, kind: input, shape index: {}]   ;;  %s153_s1 = inlined_call_operand.hbm [shape: f32[8,128], index: 1, kind: input, shape index: {}]   ;;  %s154_s2 = inlined_call_operand.hbm [shape: f32[8,128], index: 2, kind: output, shape index: {}]  }
   0x1   :  { %9 = vsyncpa [#allocation5], 0  ;;  %s17_s11 = sshll.u32 %s153_s1, 4  ;;  %s125_s12 = smov [#allocation3]   ;;  %s18_s11 = int_to_ptr.hbm [resolvable:$true] %s17_s11 }
   0x2   :  { %s19_s13 = sshll.u32 %s125_s12, 4  ;;  %s20_s13 = int_to_ptr.vmem [resolvable:$true] %s19_s13 }
   0x3   :  { %22 = dma.hbm_to_vmem [thread:$0]  %s18_s11, 128, %s20_s13, [#allocation4]  }
   0x4   :  { %121 = dma.done.wait [#allocation4], 128  }
   0x5   :  { %122 = vsyncadd [#allocation4], 4294967168  ;;  %s126_s14 = smov 1e-06   ;;  %v45_v11 = vld [vmem:[#allocation3] sm:$0xff]  ;;  %s127_s1 = smov [#allocation6]  }
   0x6   :  { %s28_s17 = smax.f32 %s126_s14, %s152_s0  ;;  %s54_s0 = sshll.u32 %s127_s1, 4  ;;  %s55_s0 = int_to_ptr.vmem [resolvable:$true] %s54_s0 }
   0x7   :  { %v29_v0 = vstv %s28_s17  ;;  %s56_s20 = sshll.u32 %s154_s2, 4  ;;  %s57_s20 = int_to_ptr.hbm [resolvable:$true] %s56_s20 }
   0x8   :  { %71 = vrcp.f32 %v29_v0  ;;  %v41_v3 = vand.u32 2147483648, %v29_v0  ;;  %vm35_vm0 = vweird.f32 %v29_v0  ;;  %v39_v5 = vand.u32 2147483647, %v29_v0 }
   0xa   :  { %v42_v7 = vor.u32 1.1754944e-38, %v41_v3  ;;  %vm40_vm3 = vcmp.eq.f32.partialorder %v39_v5, 8.507059e+37 }
   0xe   :  { %v72_v1 = vpop.eup %71 }
   0xf   :  { %v31_v2 = vmul.f32 %v72_v1, %v29_v0  ;;  %vm36_vm1 = vweird.f32 %v72_v1 }
  0x10   :  { %vm37_vm2 = vmor %vm35_vm0, %vm36_vm1 }
  0x11   :  { %v32_v4 = vsub.f32 1.0, %v31_v2 }
  0x13   :  { %v33_v6 = vmul.f32 %v72_v1, %v32_v4 }
  0x15   :  { %v34_v8 = vadd.f32 %v72_v1, %v33_v6 }
  0x17   :  { %v38_v9 = vsel %vm37_vm2, %v72_v1, %v34_v8 }
  0x18   :  { %v43_v10 = vsel %vm40_vm3, %v42_v7, %v38_v9 }
  0x19   :  { %66 = vpush %v43_v10 }
  0x4a   :  { %s67_s21 = spop %66 }
  0x4b   :  { %v46_v12 = vstv %s67_s21 }
  0x4c   :  { %v47_v13 = vmul.f32 %v46_v12, %v45_v11 }
  0x4e   :  { %48 = vst [vmem:[#allocation6] sm:$0xff] %v47_v13 }
  0x4f   :  { %59 = dma.vmem_to_hbm [thread:$0]  %s55_s0, 128, %s57_s20, [#allocation5]  }
  0x50   :  { %123 = dma.done.wait [#allocation5], 128  }
  0x51   :  { %124 = vsyncadd [#allocation5], 4294967168 }
  0x52   :  { %64 = vsyncpa [#allocation4], 1 }
  0x53   :  { %65 = vsyncpa [#allocation5], 1 }

</bundles_post_ra>
